<compile_context>
chip_gen: v7x
topology: tpu7x:2x2x1
jax: 0.10.0
libtpu: 0.0.40
codegen_flags: <defaults>
</compile_context>

<pallas_src>
import functools

import jax
import jax.numpy as jnp
from jax.experimental import pallas as pl
from jax.experimental.pallas import tpu as pltpu


# ---------------------------------------------------------------------------
# Kernel A: fused QKV projection (bf16 MXU, f32 accumulation).
# ---------------------------------------------------------------------------
def qkv_proj_kernel(src_ref, w_ref, b_ref, out_ref):
    x = src_ref[0].astype(jnp.bfloat16)                      # (TS, H)
    y = jnp.dot(x, w_ref[...], preferred_element_type=jnp.float32) + b_ref[...]
    out_ref[0] = y.astype(out_ref.dtype)                     # (TS, 3H) bf16


# ---------------------------------------------------------------------------
# Kernel B: attention (all heads batched) + out-proj + LN1 + FFN + LN2.
# ---------------------------------------------------------------------------
def attn_ffn_kernel(q_ref, k_ref, v_ref, mask_ref, src_ref,
                    wo_ref, bo_ref, ln1g_ref, ln1b_ref,
                    w1_ref, b1_ref, w2_ref, b2_ref,
                    ln2g_ref, ln2b_ref, out_ref, *, eps):
    q = q_ref[0]          # (nh, TQ, d) bf16, already scaled by 1/sqrt(d)
    k = k_ref[0]          # (nh, S,  d) bf16
    v = v_ref[0]          # (nh, S,  d) bf16
    mask = mask_ref[0]    # (1, S) f32 ; 0 => masked
    x = src_ref[0]        # (TQ, H) f32 residual input

    # scores for all heads in one batch-leading MXU contraction
    energy = jnp.einsum('hqd,hkd->hqk', q, k,
                        preferred_element_type=jnp.float32)          # (nh,TQ,S)
    bias = jnp.where(mask < 0.5, jnp.float32(-1e10), jnp.float32(0.0))  # (1,S)
    energy = energy + bias[None]                                      # key mask

    # f32 softmax (numerically stable), divide on the EUP
    m = jnp.max(energy, axis=-1, keepdims=True)
    p = jnp.exp(energy - m)
    denom = jnp.sum(p, axis=-1, keepdims=True)
    attn = p * pl.reciprocal(denom, approx=True)

    ctx = jnp.einsum('hqk,hkd->hqd', attn.astype(jnp.bfloat16), v,
                     preferred_element_type=jnp.float32)              # (nh,TQ,d)

    # output projection: Wo was pre-reshaped on host to (nh, d, H); contract d
    # per head, then reduce over heads -> no re-packing of heads into lanes.
    attn_heads = jnp.einsum('hqd,hdo->hqo', ctx.astype(jnp.bfloat16), wo_ref[...],
                            preferred_element_type=jnp.float32)       # (nh,TQ,H)
    attn_out = jnp.sum(attn_heads, axis=0) + bo_ref[...]              # (TQ, H)

    # residual + LayerNorm 1 (f32)
    y = x + attn_out
    mu = jnp.mean(y, axis=-1, keepdims=True)
    var = jnp.mean((y - mu) ** 2, axis=-1, keepdims=True)
    y = (y - mu) * jax.lax.rsqrt(var + eps) * ln1g_ref[...] + ln1b_ref[...]

    # positionwise feedforward (bf16 MXU, f32 accumulation)
    h1 = jnp.dot(y.astype(jnp.bfloat16), w1_ref[...],
                 preferred_element_type=jnp.float32) + b1_ref[...]
    h1 = jnp.maximum(h1, 0.0)
    ff = jnp.dot(h1.astype(jnp.bfloat16), w2_ref[...],
                 preferred_element_type=jnp.float32) + b2_ref[...]

    # residual + LayerNorm 2 (f32)
    z = y + ff
    mu2 = jnp.mean(z, axis=-1, keepdims=True)
    var2 = jnp.mean((z - mu2) ** 2, axis=-1, keepdims=True)
    z = (z - mu2) * jax.lax.rsqrt(var2 + eps) * ln2g_ref[...] + ln2b_ref[...]

    out_ref[0] = z.astype(out_ref.dtype)


# ---------------------------------------------------------------------------
# Host wrapper
# ---------------------------------------------------------------------------
def encoder_layer(src, src_mask, params, *, n_heads, q_tile=128, s_tile=128,
                  eps=1e-5):
    """src: (B, S, H) f32; src_mask: (B, 1, S) f32 (0 => masked key)."""
    B, S, H = src.shape
    PF = params["w1"].shape[1]
    assert H % n_heads == 0
    d = H // n_heads

    q_tile = min(q_tile, S)
    s_tile = min(s_tile, S)
    assert S % q_tile == 0 and (q_tile % 8 == 0 or q_tile == S)
    assert S % s_tile == 0 and (s_tile % 8 == 0 or s_tile == S)

    inv_scale = 1.0 / float(d) ** 0.5

    # ---- host-side parameter prep (grid-invariant, done once) ----
    wqkv = jnp.concatenate(
        [params["wq"] * inv_scale, params["wk"], params["wv"]],
        axis=1).astype(jnp.bfloat16)                                   # (H, 3H)
    bqkv = jnp.concatenate(
        [params["bq"] * inv_scale, params["bk"], params["bv"]], axis=1)  # (1,3H)
    wo3 = params["wo"].reshape(n_heads, d, H).astype(jnp.bfloat16)      # (nh,d,H)
    w1 = params["w1"].astype(jnp.bfloat16)
    w2 = params["w2"].astype(jnp.bfloat16)

    # ---- kernel A: fused QKV projection ----
    qkv = pl.pallas_call(
        qkv_proj_kernel,
        out_shape=jax.ShapeDtypeStruct((B, S, 3 * H), jnp.bfloat16),
        grid=(B, S // s_tile),
        in_specs=[
            pl.BlockSpec((1, s_tile, H), lambda b, i: (b, i, 0)),
            pl.BlockSpec((H, 3 * H), lambda b, i: (0, 0)),
            pl.BlockSpec((1, 3 * H), lambda b, i: (0, 0)),
        ],
        out_specs=pl.BlockSpec((1, s_tile, 3 * H), lambda b, i: (b, i, 0)),
        compiler_params=pltpu.CompilerParams(
            dimension_semantics=("parallel", "parallel")),
    )(src, wqkv, bqkv)

    # Head split (B,S,H) -> (B,nh,S,d): cheap XLA layout op outside the kernel,
    # keeps all in-kernel contractions batch-leading and lane-dense.
    def to_heads(t):
        return t.reshape(B, S, n_heads, d).transpose(0, 2, 1, 3)

    qh = to_heads(qkv[..., 0 * H:1 * H])
    kh = to_heads(qkv[..., 1 * H:2 * H])
    vh = to_heads(qkv[..., 2 * H:3 * H])

    kernel = functools.partial(attn_ffn_kernel, eps=eps)

    def full(shape):
        return pl.BlockSpec(shape, lambda b, i, _s=shape: (0,) * len(_s))

    in_specs = [
        pl.BlockSpec((1, n_heads, q_tile, d), lambda b, i: (b, 0, i, 0)),  # q tile
        pl.BlockSpec((1, n_heads, S, d), lambda b, i: (b, 0, 0, 0)),       # k (full)
        pl.BlockSpec((1, n_heads, S, d), lambda b, i: (b, 0, 0, 0)),       # v (full)
        pl.BlockSpec((1, 1, S), lambda b, i: (b, 0, 0)),                   # mask
        pl.BlockSpec((1, q_tile, H), lambda b, i: (b, i, 0)),              # residual
        full((n_heads, d, H)), full((1, H)),                               # Wo, bo
        full((1, H)), full((1, H)),                                        # ln1 g, b
        full((H, PF)), full((1, PF)),                                      # W1, b1
        full((PF, H)), full((1, H)),                                       # W2, b2
        full((1, H)), full((1, H)),                                        # ln2 g, b
    ]

    return pl.pallas_call(
        kernel,
        out_shape=jax.ShapeDtypeStruct((B, S, H), src.dtype),
        grid=(B, S // q_tile),
        in_specs=in_specs,
        out_specs=pl.BlockSpec((1, q_tile, H), lambda b, i: (b, i, 0)),
        compiler_params=pltpu.CompilerParams(
            dimension_semantics=("parallel", "parallel")),
    )(qh, kh, vh, src_mask, src,
      wo3, params["bo"], params["ln1_g"], params["ln1_b"],
      w1, params["b1"], w2, params["b2"],
      params["ln2_g"], params["ln2_b"])


# ---------------------------------------------------------------------------
# Pure-JAX reference (mirrors the PyTorch module in eval mode) + params
# ---------------------------------------------------------------------------
def encoder_layer_ref(src, src_mask, params, *, n_heads, eps=1e-5):
    B, S, H = src.shape
    d = H // n_heads

    def linear(x, w, b):
        return jnp.einsum('bsi,io->bso', x, w) + b

    def layer_norm(x, g, b):
        mu = jnp.mean(x, axis=-1, keepdims=True)
        var = jnp.mean((x - mu) ** 2, axis=-1, keepdims=True)
        return (x - mu) * jax.lax.rsqrt(var + eps) * g + b

    q = linear(src, params["wq"], params["bq"])
    k = linear(src, params["wk"], params["bk"])
    v = linear(src, params["wv"], params["bv"])

    def heads(t):
        return t.reshape(B, S, n_heads, d).transpose(0, 2, 1, 3)

    qh, kh, vh = heads(q), heads(k), heads(v)
    energy = jnp.einsum('bhqd,bhkd->bhqk', qh, kh) / jnp.sqrt(jnp.float32(d))
    mask4 = src_mask[:, :, None, :]                    # (B,1,1,S)
    energy = jnp.where(mask4 == 0, jnp.float32(-1e10), energy)
    attn = jax.nn.softmax(energy, axis=-1)
    ctx = jnp.einsum('bhqk,bhkd->bhqd', attn, vh)
    ctx = ctx.transpose(0, 2, 1, 3).reshape(B, S, H)
    attn_out = linear(ctx, params["wo"], params["bo"])

    y = layer_norm(src + attn_out, params["ln1_g"], params["ln1_b"])
    ff = jnp.maximum(linear(y, params["w1"], params["b1"]), 0.0)
    ff = linear(ff, params["w2"], params["b2"])
    return layer_norm(y + ff, params["ln2_g"], params["ln2_b"])


def init_params(key, hid_dim, pf_dim):
    keys = jax.random.split(key, 12)
    s = 0.1
    return {
        "wq": jax.random.normal(keys[0], (hid_dim, hid_dim), jnp.float32) * s,
        "bq": jax.random.normal(keys[1], (1, hid_dim), jnp.float32) * s,
        "wk": jax.random.normal(keys[2], (hid_dim, hid_dim), jnp.float32) * s,
        "bk": jax.random.normal(keys[3], (1, hid_dim), jnp.float32) * s,
        "wv": jax.random.normal(keys[4], (hid_dim, hid_dim), jnp.float32) * s,
        "bv": jax.random.normal(keys[5], (1, hid_dim), jnp.float32) * s,
        "wo": jax.random.normal(keys[6], (hid_dim, hid_dim), jnp.float32) * s,
        "bo": jax.random.normal(keys[7], (1, hid_dim), jnp.float32) * s,
        "ln1_g": jnp.ones((1, hid_dim), jnp.float32),
        "ln1_b": jnp.zeros((1, hid_dim), jnp.float32),
        "w1": jax.random.normal(keys[8], (hid_dim, pf_dim), jnp.float32) * s,
        "b1": jax.random.normal(keys[9], (1, pf_dim), jnp.float32) * s,
        "w2": jax.random.normal(keys[10], (pf_dim, hid_dim), jnp.float32) * s,
        "b2": jax.random.normal(keys[11], (1, hid_dim), jnp.float32) * s,
        "ln2_g": jnp.ones((1, hid_dim), jnp.float32),
        "ln2_b": jnp.zeros((1, hid_dim), jnp.float32),
    }


if __name__ == "__main__":
    # lane-dense small config: H=256 (>=128), head_dim=128, PF=512
    B, S, HID, N_HEADS, PF = 2, 16, 256, 2, 512

    key = jax.random.PRNGKey(0)
    k_src, k_param = jax.random.split(key)

    src = jax.random.normal(k_src, (B, S, HID), jnp.float32)
    # src_mask: 1 = attend, 0 = masked (broadcast over heads & query positions)
    src_mask = jnp.ones((B, 1, S), jnp.float32)
    src_mask = src_mask.at[1, 0, 11:].set(0.0)   # pad out last 5 tokens of batch 1

    params = init_params(k_param, HID, PF)

    out = encoder_layer(src, src_mask, params, n_heads=N_HEADS,
                        q_tile=8, s_tile=8)
    out = jax.block_until_ready(out)
    assert out.shape == (B, S, HID)

    # correctness check vs. f32 reference (kernel uses bf16 MXU operands)
    ref = encoder_layer_ref(src, src_mask, params, n_heads=N_HEADS)
    rel_err = float(jnp.linalg.norm(out - ref) / jnp.linalg.norm(ref))
    assert rel_err < 0.1, f"mismatch vs reference: rel_err={rel_err}"

    print("KERNEL_OK")
</pallas_src>

<mosaic_0001>
module attributes {stable_mosaic.version = 11 : i64} {
  func.func @qkv_proj_kernel(%arg0: i32, %arg1: i32, %arg2: memref<1x8x256xf32, #tpu.memory_space<vmem>>, %arg3: memref<256x768xbf16, #tpu.memory_space<vmem>>, %arg4: memref<1x768xf32, #tpu.memory_space<vmem>>, %arg5: memref<1x8x768xbf16, #tpu.memory_space<vmem>>) attributes {dimension_semantics = [#tpu.dimension_semantics<parallel>, #tpu.dimension_semantics<parallel>], iteration_bounds = array<i64: 2, 2>, scalar_prefetch = 0 : i64, scratch_operands = 0 : i64, tpu.core_type = #tpu.core_type<tc>, window_params = [{transform_indices = @transform_0, window_bounds = array<i64: 1, 8, 256>}, {pipeline_mode = #tpu.pipeline_mode<synchronous>, transform_indices = @transform_1, window_bounds = array<i64: 256, 768>}, {pipeline_mode = #tpu.pipeline_mode<synchronous>, transform_indices = @transform_2, window_bounds = array<i64: 1, 768>}, {transform_indices = @transform_3, window_bounds = array<i64: 1, 8, 768>}]} {
    %c0 = arith.constant 0 : index
    %c0_0 = arith.constant 0 : index
    %c0_1 = arith.constant 0 : index
    %0 = vector.load %arg2[%c0, %c0_0, %c0_1] : memref<1x8x256xf32, #tpu.memory_space<vmem>>, vector<1x8x256xf32>
    %1 = vector.shape_cast %0 : vector<1x8x256xf32> to vector<8x256xf32>
    %2 = arith.truncf %1 : vector<8x256xf32> to vector<8x256xbf16>
    %c0_2 = arith.constant 0 : index
    %c0_3 = arith.constant 0 : index
    %3 = vector.load %arg3[%c0_2, %c0_3] : memref<256x768xbf16, #tpu.memory_space<vmem>>, vector<256x768xbf16>
    %cst = arith.constant dense<0.000000e+00> : vector<8x768xf32>
    %4 = tpu.matmul %2, %3, %cst {dimension_numbers = #tpu.dot_dimension_numbers<[1], [0], [0], [1], [0, 0, 1, 1], [], []>} : vector<8x256xbf16>, vector<256x768xbf16>, vector<8x768xf32> -> vector<8x768xf32>
    %c0_4 = arith.constant 0 : index
    %c0_5 = arith.constant 0 : index
    %5 = vector.load %arg4[%c0_4, %c0_5] : memref<1x768xf32, #tpu.memory_space<vmem>>, vector<1x768xf32>
    %6 = vector.broadcast %5 : vector<1x768xf32> to vector<8x768xf32>
    %7 = arith.addf %4, %6 : vector<8x768xf32>
    %8 = arith.truncf %7 : vector<8x768xf32> to vector<8x768xbf16>
    %c0_6 = arith.constant 0 : index
    %c0_7 = arith.constant 0 : index
    %c0_8 = arith.constant 0 : index
    %9 = vector.load %arg5[%c0_6, %c0_7, %c0_8] : memref<1x8x768xbf16, #tpu.memory_space<vmem>>, vector<1x8x768xbf16>
    %10 = vector.shape_cast %9 : vector<1x8x768xbf16> to vector<8x768xbf16>
    %11 = vector.shape_cast %8 : vector<8x768xbf16> to vector<1x8x768xbf16>
    tpu.vector_store %arg5[%c0_6, %c0_7, %c0_8], %11 {strides = array<i32>} : memref<1x8x768xbf16, #tpu.memory_space<vmem>>, vector<1x8x768xbf16>,
    return
  }
  func.func @transform_0(%arg0: i32, %arg1: i32) -> (i32, i32, i32) {
    %c0_i32 = arith.constant 0 : i32
    %c0_i32_0 = arith.constant 0 : i32
    return %arg0, %arg1, %c0_i32 : i32, i32, i32
  }
  func.func @transform_1(%arg0: i32, %arg1: i32) -> (i32, i32) {
    %c0_i32 = arith.constant 0 : i32
    %c0_i32_0 = arith.constant 0 : i32
    %c0_i32_1 = arith.constant 0 : i32
    return %c0_i32, %c0_i32_0 : i32, i32
  }
  func.func @transform_2(%arg0: i32, %arg1: i32) -> (i32, i32) {
    %c0_i32 = arith.constant 0 : i32
    %c0_i32_0 = arith.constant 0 : i32
    %c0_i32_1 = arith.constant 0 : i32
    return %c0_i32, %c0_i32_0 : i32, i32
  }
  func.func @transform_3(%arg0: i32, %arg1: i32) -> (i32, i32, i32) {
    %c0_i32 = arith.constant 0 : i32
    %c0_i32_0 = arith.constant 0 : i32
    return %arg0, %arg1, %c0_i32 : i32, i32, i32
  }
}

</mosaic_0001>

<bundles_post_ra>
// kernel: tpu_custom_call.1
= control target key start
LH: loop header
LB: loop body
LE: loop exit
PB: predicated region body
PF: predicated region fallthrough
CT: control target
= control target key end

     0   :  { %s1894_s0 = inlined_call_operand.hbm [shape: f32[2,16,256], index: 0, kind: input, shape index: {}]   ;;  %s1895_s1 = inlined_call_operand.hbm [shape: bf16[256,768], index: 1, kind: input, shape index: {}]   ;;  %s1896_s2 = inlined_call_operand.vmem [shape: f32[1,768], index: 2, kind: input, shape index: {}]   ;;  %s1897_s3 = inlined_call_operand.hbm [shape: bf16[2,16,768], index: 3, kind: output, shape index: {}]  }
   0x1   :  { %1906 = sst [smem:[#allocation15_spill]] %s1895_s1 }
   0x2   :  { %8 = vsyncpa [#allocation3], 0 }
   0x3   :  { %10 = vsyncpa [#allocation3 + $0x1], 0 }
   0x4   :  { %11 = vsyncpa [#allocation6], 0 }
   0x5   :  { %12 = vsyncpa [#allocation4], 0 }
   0x6   :  { %14 = vsyncpa [#allocation4 + $0x1], 0  ;;  %s1638_s12 = smov 0   ;;  %s1640_s13 = smov 0  }
   0x7   :  { %s1642_s14 = smov 0   ;;  %s1644_s15 = smov 0  }
   0x8   :  { %s1646_s16 = smov 0   ;;  %s1648_s17 = smov 0  }
   0x9   :  { %s1650_s18 = smov 0   ;;  %s1652_s19 = smov 0  }
   0xa LB: > { %1907 = sst [smem:[#allocation11_spill]] %s1603_s17  ;;  %s1096_s20 = sadd.s32 4294967295, %s1611_s19   ;;  %s1611_s19 = sphi %s1652_s19, %s20_s19   ;;  %s1607_s18 = sphi %s1650_s18, %s1934_s18   ;;  %s1603_s17 = sphi %s1648_s17, %s1928_s17   ;;  %s1599_s16 = sphi %s1646_s16, %s1933_s16   ;;  %s1595_s15 = sphi %s1644_s15, %s1927_s15   ;;  %s1591_s14 = sphi %s1642_s14, %s1932_s14   ;;  %s1587_s13 = sphi %s1640_s13, %s1931_s13   ;;  %s1583_s12 = sphi %s1638_s12, %s1930_s12  }
   0xb   : > { %s1097_s21 = sadd.s32 4294967294, %s1611_s19   ;;  %p54_p0 = scmp.ne.s32.totalorder %s1587_s13, %s1583_s12 }
   0xc   : > { %p1682_p1 = scmp.eq.s32.totalorder %s1096_s20, 0  ;;  %p1686_p2 = scmp.eq.s32.totalorder %s1096_s20, 3 }
   0xd   : > { %p128_p3 = scmp.eq.s32.totalorder %s1097_s21, 3  ;;  %p1098_p5 = scmp.ge.s32.totalorder %s1611_s19, 1 }
   0xe   : > { %s1908_s22 = scalar_select %p1682_p1, 1, 0 }
   0xf   : > { %s1909_s23 = scalar_select %p1686_p2, 1, 0 }
  0x10   : > { %p1692_p4 = por %p1682_p1, %p54_p0  ;;  %p1697_p6 = por %p128_p3, %p54_p0 }
  0x11   : > { %p135_p7 = scmp.lt.s32.totalorder %s1611_s19, 5  ;;  %s1613_s27 = smov [#allocation5]  }
  0x12   : > { %s1910_s24 = scalar_select %p1692_p4, 1, 0 }
  0x13   : > { %s1911_s25 = scalar_select %p1697_p6, 1, 0 }
  0x14   : > { %p1702_p8 = pnand %p1098_p5, %p135_p7  ;;  %s147_s28 = sshll.u32 %s1613_s27, 4  ;;  %s148_s28 = int_to_ptr.vmem [resolvable:$true] %s147_s28 }
  0x15   : > { %1912 = sst [smem:[#allocation12_spill]] %s1911_s25  ;;  %s1915_s1 = sld [smem:[#allocation15_spill]] }
  0x16   : > { %s1913_s26 = scalar_select %p1702_p8, 1, 0 }
  0x17   : > { %p1224_p9 = pneg %p1702_p8 }
  0x19   : > { %p1710_p10 = pnand %p1224_p9, %p1682_p1 }
  0x1b   : > { %s1451_s5 = scalar_lea.hbm %s1915_s1, 12288  ;;  %p1453_p12 = pneg %p1710_p10 }
  0x1c   : > { %p1452_p11 = scmp.ne.s32.totalorder %s1915_s1, %s1451_s5  ;;  %p1458_p3 = scmp.lt.u32.totalorder %s1451_s5, %s1915_s1 }
  0x1e   : > { %p1454_p13 = pnand %p1453_p12, %p1452_p11 }
  0x20   : > { %p1455_p0 = pneg %p1454_p13 }
  0x22   : > { %p1460_p5 = pnand %p1458_p3, %p1455_p0 }
  0x24   : > { %1463 = shalt.err (!%p1460_p5)
}
  0x25   : > { %s1464_s10 = scalar_lea.vmem %s148_s28, 12288  ;;  %p1472_p1 = scmp.lt.s32.totalorder %s148_s28, %s148_s28 }
  0x26   : > { %p1465_p7 = scmp.ne.s32.totalorder %s148_s28, %s1464_s10  ;;  %p1473_p4 = scmp.lt.s32.totalorder %s1464_s10, %s1464_s10 }
  0x28   : > { %p1467_p9 = pnand %p1465_p7, %p1453_p12  ;;  %p1474_p8 = por %p1473_p4, %p1472_p1 }
  0x2a   : > { %p1468_p6 = pneg %p1467_p9 }
  0x2c   : > { %p1475_p2 = pnand %p1474_p8, %p1468_p6 }
  0x2e   : > { %1478 = shalt.err (!%p1475_p2)
}
  0x2f   : > { %s1614_s11 = smov 384   ;;  %s1615_s20 = smov 24  }
  0x30   : > { %1227 = dma.hbm_to_vmem [thread:$0]  (!%p1710_p10), %s1915_s1, 12288, %s148_s28, [#allocation6], %s1614_s11, %s1614_s11, %s1615_s20  }
  0x31   : > { %s29_s30 = sadd.s32 1, %s1603_s17  ;;  %s32_s4 = sadd.s32 1, %s1607_s18 }
  0x32   : > { %p30_p1 = scmp.ge.s32.totalorder %s29_s30, 2  ;;  %s41_s5 = sadd.s32 1, %s1591_s14 }
  0x33   : > { %p48_p2 = scmp.ne.s32.totalorder %s1591_s14, %s1587_s13  ;;  %p49_p4 = scmp.eq.s32.totalorder %s1611_s19, 0 }
  0x34   : > { %s1936_s30 = smov (%p30_p1, %s29_s30), 0  ;;  %s1938_s4 = smov (!%p30_p1, %s32_s4), %s1607_s18 }
  0x35   : > { %1916 = sst [smem:[#allocation13_spill]] %s1936_s30  ;;  %s37_s6 = ssub.s32 %s1603_s17, %s1936_s30 }
  0x36   : > { %p34_p6 = scmp.ge.s32.totalorder %s1938_s4, 2  ;;  %p1917_p8 = scmp.ne.s32.totalorder %s1909_s23, 0 }
  0x37   : > { %p1747_p10 = por %p49_p4, %p48_p2  ;;  %p1237_p12 = scmp.lt.s32.totalorder %s1611_s19, 4 }
  0x38   : > { %p1743_p11 = por %p1917_p8, %p48_p2  ;;  %s1940_s4 = smov (%p34_p6, %s1938_s4), 0 }
  0x39   : > { %1920 = sst [smem:[#allocation14_spill]] %s1940_s4  ;;  %s164_s7 = sand.u32 1, %s1591_s14  }
  0x3a   : > { %s1102_s8 = sshll.u32 %s1603_s17, 1  ;;  %s36_s9 = ssub.s32 %s1607_s18, %s1940_s4 }
  0x3b   : > { %s38_s10 = sor.u32 %s37_s6, %s36_s9  ;;  %s1101_s11 = sshll.u32 %s164_s7, 4 }
  0x3c   : > { %p39_p13 = scmp.eq.s32.totalorder %s38_s10, 0  ;;  %s1103_s23 = sshll.u32 %s1607_s18, 2 }
  0x3d   : > { %s168_s20 = scalar_lea.vmem [#allocation2], %s1101_s11  ;;  %s174_s1 = sadd.s32 %s1103_s23, %s1102_s8 }
  0x3e   : > { %s178_s21 = sshll.u32 %s168_s20, 4  ;;  %s1104_s30 = sshll.u32 %s174_s1, 7  ;;  %s1762_s21 = int_to_ptr.vmem [resolvable:$true] %s178_s21 }
  0x3f   : > { %s1760_s27 = scalar_select %p39_p13, %s1591_s14, %s41_s5  }
  0x40   : > { %p1768_p0 = pnand %p1237_p12, %p1747_p10  ;;  %s1775_s6 = scalar_lea.hbm %s1894_s0, %s1104_s30 }
  0x41   : > { %s165_s5 = scalar_lea.sflag [#allocation3], %s164_s7  ;;  %s1479_s8 = scalar_lea.hbm %s1775_s6, 256 }
  0x42   : > { %p1480_p3 = scmp.ne.s32.totalorder %s1775_s6, %s1479_s8  ;;  %p1481_p5 = pneg %p1768_p0 }
  0x43   : > { %s1484_s17 = scalar_lea.hbm %s1894_s0, 1024  ;;  %p1485_p1 = scmp.lt.u32.totalorder %s1775_s6, %s1894_s0 }
  0x44   : > { %p1482_p7 = pnand %p1481_p5, %p1480_p3  ;;  %p1486_p2 = scmp.lt.u32.totalorder %s1484_s17, %s1479_s8 }
  0x45   : > { %p1488_p6 = scmp.lt.u32.totalorder %s1479_s8, %s1775_s6 }
  0x46   : > { %p1483_p9 = pneg %p1482_p7  ;;  %p1487_p4 = por %p1486_p2, %p1485_p1 }
  0x48   : > { %p1489_p8 = por %p1488_p6, %p1487_p4 }
  0x4a   : > { %p1490_p10 = pnand %p1489_p8, %p1483_p9 }
  0x4c   : > { %1493 = shalt.err (!%p1490_p10)
}
  0x4d   : > { %s1494_s7 = scalar_lea.vmem %s1762_s21, 256  ;;  %s1616_s9 = smov [#allocation2]  }
  0x4e   : > { %p1495_p12 = scmp.ne.s32.totalorder %s1762_s21, %s1494_s7  ;;  %s1499_s10 = sshll.u32 %s1616_s9, 4  ;;  %s1500_s10 = int_to_ptr.vmem [resolvable:$false] %s1499_s10 }
  0x4f   : > { %s1501_s11 = scalar_lea.vmem %s1500_s10, 512  ;;  %p1502_p7 = scmp.lt.s32.totalorder %s1762_s21, %s1500_s10 }
  0x50   : > { %p1497_p13 = pnand %p1495_p12, %p1481_p5  ;;  %p1503_p1 = scmp.lt.s32.totalorder %s1501_s11, %s1494_s7 }
  0x52   : > { %p1498_p3 = pneg %p1497_p13  ;;  %p1504_p2 = por %p1503_p1, %p1502_p7 }
  0x54   : > { %p1505_p4 = pnand %p1504_p2, %p1498_p3 }
  0x56   : > { %1508 = shalt.err (!%p1505_p4)
}
  0x57   : > { %1231 = dma.hbm_to_vmem [thread:$0]  (!%p1768_p0), %s1775_s6, 256, %s1762_s21, %s165_s5  }
  0x58   : > { %p1922_p9 = scmp.ne.s32.totalorder %s1913_s26, 0 }
  0x59   : > { %s1805_s23 = sand.u32 (!%p1922_p9), 1, %s1587_s13   ;;  %p1923_p5 = scmp.ne.s32.totalorder (!%p1922_p9), %s1910_s24, 0 }
  0x5a   : > { %187 = sbr.rel (%p1922_p9) target bundleno = 461 (0x1cd), region = 32  ;;  %s1106_s20 = sshll.u32 (!%p1922_p9), %s1805_s23, 4 }
  0x5b   : > { %s190_s8 = scalar_lea.sflag (!%p1922_p9), [#allocation3], %s1805_s23  ;;  %s1809_s1 = scalar_lea.vmem (!%p1922_p9), [#allocation2], %s1106_s20 }
  0x61   : > { %1570 = dma.done.wait (%p1923_p5), %s190_s8, 256  }
  0x62   : > { %1572 = vsyncadd (%p1923_p5), %s190_s8, 4294967040  ;;  %p1924_p0 = scmp.ne.s32.totalorder %s1908_s22, 0 }
  0x64   : > { %1574 = dma.done.wait (%p1924_p0), [#allocation6], 12288  }
  0x65   : > { %1576 = vsyncadd (%p1924_p0), [#allocation6], 4294955008  ;;  %v1307_v0 = vld [vmem:[#allocation5 + $0x4] ss:$24 sps:$4 sm:$0xff]   ;;  %v1309_v1 = vld [vmem:[#allocation5] ss:$24 sps:$4 sm:$0xff]  }
  0x66   : > { %832 = vmatprep.subr.bf16.mxu0 %v1307_v0  ;;  %v1310_v2 = vld [vmem:[#allocation5 + $0x34] ss:$24 sps:$4 sm:$0xff]   ;;  %v1312_v3 = vld [vmem:[#allocation5 + $0x30] ss:$24 sps:$4 sm:$0xff]   ;;  %v1313_v4 = vld [vmem:[#allocation5 + $0x64] ss:$24 sps:$4 sm:$0xff]  }
  0x67   : > { %833 = vmatpush1.bf16.msra.mxu0 %v1309_v1  ;;  %v1315_v5 = vld [vmem:[#allocation5 + $0x60] ss:$24 sps:$4 sm:$0xff]   ;;  %v1316_v6 = vld [vmem:[#allocation5 + $0x94] ss:$24 sps:$4 sm:$0xff]   ;;  %v1318_v7 = vld [vmem:[#allocation5 + $0x90] ss:$24 sps:$4 sm:$0xff]  }
  0x68   : > { %834 = vmatprep.subr.bf16.mxu0 %v1310_v2  ;;  %v1319_v8 = vld [vmem:[#allocation5 + $0xc4] ss:$24 sps:$4 sm:$0xff]   ;;  %v1321_v9 = vld [vmem:[#allocation5 + $0xc0] ss:$24 sps:$4 sm:$0xff]   ;;  %v1322_v10 = vld [vmem:[#allocation5 + $0xf4] ss:$24 sps:$4 sm:$0xff]  }
  0x69   : > { %v1324_v11 = vld [vmem:[#allocation5 + $0xf0] ss:$24 sps:$4 sm:$0xff]   ;;  %v1325_v12 = vld [vmem:[#allocation5 + $0x124] ss:$24 sps:$4 sm:$0xff]   ;;  %v1327_v16 = vld [vmem:[#allocation5 + $0x120] ss:$24 sps:$4 sm:$0xff]  }
  0x6a   : > { %v1355_v13 = vld [vmem:[#allocation5 + $0xc] ss:$24 sps:$4 sm:$0xff]   ;;  %v1357_v14 = vld [vmem:[#allocation5 + $0x8] ss:$24 sps:$4 sm:$0xff]   ;;  %v1361_v19 = vld [vmem:[#allocation5 + $0x3c] ss:$24 sps:$4 sm:$0xff]  }
  0x6b   : > { %835 = vmatpush1.bf16.msra.mxu0 %v1312_v3  ;;  %v221_v15 = vld [vmem:[%s1809_s1 + $0x8] sm:$0xff]  ;;  %873 = vmatprep.subr.bf16.mxu1 %v1355_v13  ;;  %v220_v55 = vld [vmem:[%s1809_s1] sm:$0xff]  ;;  %s1213_s25 = smul.u32 24, %s1805_s23  ;;  %s1617_s9 = smov [#allocation7]  }
  0x6c   : > { %836 = vmatprep.subr.bf16.mxu0 %v1313_v4  ;;  %v1820_v17 = vpack.c.bf16 %v221_v15, %v221_v15  ;;  %v1328_v18 = vld [vmem:[#allocation5 + $0x154] ss:$24 sps:$4 sm:$0xff]   ;;  %874 = vmatpush1.bf16.msra.mxu1 %v1357_v14  ;;  %v1363_v20 = vld [vmem:[#allocation5 + $0x38] ss:$24 sps:$4 sm:$0xff]   ;;  %v1331_v22 = vld [vmem:[#allocation5 + $0x184] ss:$24 sps:$4 sm:$0xff]   ;;  %v1825_v58 = vpack.c.bf16 %v220_v55, %v220_v55 }
  0x6d   : > { %v1330_v21 = vld [vmem:[#allocation5 + $0x150] ss:$24 sps:$4 sm:$0xff]   ;;  %875 = vmatprep.subr.bf16.mxu1 %v1361_v19  ;;  %v1367_v23 = vld [vmem:[#allocation5 + $0x6c] ss:$24 sps:$4 sm:$0xff]   ;;  %v1373_v25 = vld [vmem:[#allocation5 + $0x9c] ss:$24 sps:$4 sm:$0xff]  }
  0x6e   : > { %864 = vmatprep.mubr.bf16.mxu0 %v1820_v17  ;;  %905 = vmatprep.mubr.bf16.mxu1 %v1820_v17  ;;  %v1369_v24 = vld [vmem:[#allocation5 + $0x68] ss:$24 sps:$4 sm:$0xff]   ;;  %v1334_v27 = vld [vmem:[#allocation5 + $0x1b4] ss:$24 sps:$4 sm:$0xff]   ;;  %v1375_v28 = vld [vmem:[#allocation5 + $0x98] ss:$24 sps:$4 sm:$0xff]  }
  0x6f   : > { %837 = vmatpush1.bf16.msra.mxu0 %v1315_v5  ;;  %v1333_v26 = vld [vmem:[#allocation5 + $0x180] ss:$24 sps:$4 sm:$0xff]   ;;  %v1379_v29 = vld [vmem:[#allocation5 + $0xcc] ss:$24 sps:$4 sm:$0xff]   ;;  %v1336_v30 = vld [vmem:[#allocation5 + $0x1b0] ss:$24 sps:$4 sm:$0xff]  }
  0x70   : > { %838 = vmatprep.subr.bf16.mxu0 %v1316_v6  ;;  %876 = vmatpush1.bf16.msra.mxu1 %v1363_v20  ;;  %v1337_v31 = vld [vmem:[#allocation5 + $0x1e4] ss:$24 sps:$4 sm:$0xff]   ;;  %v1381_v32 = vld [vmem:[#allocation5 + $0xc8] ss:$24 sps:$4 sm:$0xff]   ;;  %v1340_v35 = vld [vmem:[#allocation5 + $0x214] ss:$24 sps:$4 sm:$0xff]  }
  0x71   : > { %877 = vmatprep.subr.bf16.mxu1 %v1367_v23  ;;  %v1385_v33 = vld [vmem:[#allocation5 + $0xfc] ss:$24 sps:$4 sm:$0xff]   ;;  %v1339_v34 = vld [vmem:[#allocation5 + $0x1e0] ss:$24 sps:$4 sm:$0xff]   ;;  %v1391_v37 = vld [vmem:[#allocation5 + $0x12c] ss:$24 sps:$4 sm:$0xff]  }
  0x72   : > { %v1387_v36 = vld [vmem:[#allocation5 + $0xf8] ss:$24 sps:$4 sm:$0xff]   ;;  %v1343_v39 = vld [vmem:[#allocation5 + $0x244] ss:$24 sps:$4 sm:$0xff]   ;;  %v1393_v40 = vld [vmem:[#allocation5 + $0x128] ss:$24 sps:$4 sm:$0xff]  }
  0x73   : > { %839 = vmatpush1.bf16.msra.mxu0 %v1318_v7  ;;  %v1342_v38 = vld [vmem:[#allocation5 + $0x210] ss:$24 sps:$4 sm:$0xff]   ;;  %v1397_v41 = vld [vmem:[#allocation5 + $0x15c] ss:$24 sps:$4 sm:$0xff]   ;;  %v1345_v42 = vld [vmem:[#allocation5 + $0x240] ss:$24 sps:$4 sm:$0xff]  }
  0x74   : > { %840 = vmatprep.subr.bf16.mxu0 %v1319_v8  ;;  %878 = vmatpush1.bf16.msra.mxu1 %v1369_v24  ;;  %v1346_v43 = vld [vmem:[#allocation5 + $0x274] ss:$24 sps:$4 sm:$0xff]   ;;  %v1399_v44 = vld [vmem:[#allocation5 + $0x158] ss:$24 sps:$4 sm:$0xff]   ;;  %v1349_v47 = vld [vmem:[#allocation5 + $0x2a4] ss:$24 sps:$4 sm:$0xff]  }
  0x75   : > { %879 = vmatprep.subr.bf16.mxu1 %v1373_v25  ;;  %v1403_v45 = vld [vmem:[#allocation5 + $0x18c] ss:$24 sps:$4 sm:$0xff]   ;;  %v1348_v46 = vld [vmem:[#allocation5 + $0x270] ss:$24 sps:$4 sm:$0xff]   ;;  %v1409_v49 = vld [vmem:[#allocation5 + $0x1bc] ss:$24 sps:$4 sm:$0xff]  }
  0x76   : > { %v1405_v48 = vld [vmem:[#allocation5 + $0x188] ss:$24 sps:$4 sm:$0xff]   ;;  %v1352_v51 = vld [vmem:[#allocation5 + $0x2d4] ss:$24 sps:$4 sm:$0xff]   ;;  %v1411_v53 = vld [vmem:[#allocation5 + $0x1b8] ss:$24 sps:$4 sm:$0xff]  }
  0x77   : > { %841 = vmatpush1.bf16.msra.mxu0 %v1321_v9  ;;  %v1351_v50 = vld [vmem:[#allocation5 + $0x2a0] ss:$24 sps:$4 sm:$0xff]   ;;  %v1354_v52 = vld [vmem:[#allocation5 + $0x2d0] ss:$24 sps:$4 sm:$0xff]   ;;  %v1415_v54 = vld [vmem:[#allocation5 + $0x1ec] ss:$24 sps:$4 sm:$0xff]  }
  0x78   : > { %842 = vmatprep.subr.bf16.mxu0 %v1322_v10  ;;  %880 = vmatpush1.bf16.msra.mxu1 %v1375_v28  ;;  %v1360_v56 = vld [vmem:[#allocation5 + $0x14] ss:$24 sps:$4 sm:$0xff]   ;;  %v1417_v57 = vld [vmem:[#allocation5 + $0x1e8] ss:$24 sps:$4 sm:$0xff]   ;;  %v1366_v61 = vld [vmem:[#allocation5 + $0x44] ss:$24 sps:$4 sm:$0xff]  }
  0x79   : > { %881 = vmatprep.subr.bf16.mxu1 %v1379_v29  ;;  %v1421_v59 = vld [vmem:[#allocation5 + $0x21c] ss:$24 sps:$4 sm:$0xff]   ;;  %v1358_v60 = vld [vmem:[#allocation5 + $0x10] ss:$24 sps:$4 sm:$0xff]   ;;  %v1427_v63 = vld [vmem:[#allocation5 + $0x24c] ss:$24 sps:$4 sm:$0xff]  }
  0x7a   : > { %v1423_v62 = vld [vmem:[#allocation5 + $0x218] ss:$24 sps:$4 sm:$0xff]   ;;  %v1372_v1 = vld [vmem:[#allocation5 + $0x74] ss:$24 sps:$4 sm:$0xff]   ;;  %v1429_v2 = vld [vmem:[#allocation5 + $0x248] ss:$24 sps:$4 sm:$0xff]  }
  0x7b   : > { %843 = vmatpush1.bf16.msra.mxu0 %v1324_v11  ;;  %v1364_v0 = vld [vmem:[#allocation5 + $0x40] ss:$24 sps:$4 sm:$0xff]   ;;  %v1433_v3 = vld [vmem:[#allocation5 + $0x27c] ss:$24 sps:$4 sm:$0xff]   ;;  %v1370_v4 = vld [vmem:[#allocation5 + $0x70] ss:$24 sps:$4 sm:$0xff]  }
  0x7c   : > { %844 = vmatprep.subr.bf16.mxu0 %v1325_v12  ;;  %882 = vmatpush1.bf16.msra.mxu1 %v1381_v32  ;;  %v1378_v5 = vld [vmem:[#allocation5 + $0xa4] ss:$24 sps:$4 sm:$0xff]   ;;  %v1435_v6 = vld [vmem:[#allocation5 + $0x278] ss:$24 sps:$4 sm:$0xff]   ;;  %v1384_v9 = vld [vmem:[#allocation5 + $0xd4] ss:$24 sps:$4 sm:$0xff]  }
  0x7d   : > { %883 = vmatprep.subr.bf16.mxu1 %v1385_v33  ;;  %v1439_v7 = vld [vmem:[#allocation5 + $0x2ac] ss:$24 sps:$4 sm:$0xff]   ;;  %v1376_v8 = vld [vmem:[#allocation5 + $0xa0] ss:$24 sps:$4 sm:$0xff]   ;;  %v1445_v11 = vld [vmem:[#allocation5 + $0x2dc] ss:$24 sps:$4 sm:$0xff]  }
  0x7e   : > { %v1441_v10 = vld [vmem:[#allocation5 + $0x2a8] ss:$24 sps:$4 sm:$0xff]   ;;  %v1390_v13 = vld [vmem:[#allocation5 + $0x104] ss:$24 sps:$4 sm:$0xff]   ;;  %v1447_v14 = vld [vmem:[#allocation5 + $0x2d8] ss:$24 sps:$4 sm:$0xff]  }
  0x7f   : > { %845 = vmatpush1.bf16.msra.mxu0 %v1327_v16  ;;  %v1382_v12 = vld [vmem:[#allocation5 + $0xd0] ss:$24 sps:$4 sm:$0xff]   ;;  %v1388_v15 = vld [vmem:[#allocation5 + $0x100] ss:$24 sps:$4 sm:$0xff]   ;;  %v1396_v16 = vld [vmem:[#allocation5 + $0x134] ss:$24 sps:$4 sm:$0xff]  }
  0x80   : > { %846 = vmatprep.subr.bf16.mxu0 %v1328_v18  ;;  %884 = vmatpush1.bf16.msra.mxu1 %v1387_v36  ;;  %v1402_v18 = vld [vmem:[#allocation5 + $0x164] ss:$24 sps:$4 sm:$0xff]   ;;  %v1400_v19 = vld [vmem:[#allocation5 + $0x160] ss:$24 sps:$4 sm:$0xff]   ;;  %v1408_v20 = vld [vmem:[#allocation5 + $0x194] ss:$24 sps:$4 sm:$0xff]   ;;  %v322_v36 = vlaneseq }
  0x81   : > { %885 = vmatprep.subr.bf16.mxu1 %v1391_v37  ;;  %v1412_v23 = vld [vmem:[#allocation5 + $0x1c0] ss:$24 sps:$4 sm:$0xff]   ;;  %v1420_v24 = vld [vmem:[#allocation5 + $0x1f4] ss:$24 sps:$4 sm:$0xff]   ;;  %v1418_v25 = vld [vmem:[#allocation5 + $0x1f0] ss:$24 sps:$4 sm:$0xff]  }
  0x82   : > { %v1432_v28 = vld [vmem:[#allocation5 + $0x254] ss:$24 sps:$4 sm:$0xff]   ;;  %v1430_v29 = vld [vmem:[#allocation5 + $0x250] ss:$24 sps:$4 sm:$0xff]   ;;  %v323_v37 = vshrl.u32 %v322_v36, 7  ;;  %s219_s26 = scalar_lea.vmem [#allocation7], %s1213_s25 }
  0x83   : > { %847 = vmatpush1.bf16.msra.mxu0 %v1330_v21  ;;  %v1406_v21 = vld [vmem:[#allocation5 + $0x190] ss:$24 sps:$4 sm:$0xff]   ;;  %v1444_v32 = vld [vmem:[#allocation5 + $0x2b4] ss:$24 sps:$4 sm:$0xff]   ;;  %s1214_s21 = smul.u32 6, %s1595_s15  ;;  %s999_s17 = sshll.u32 %s219_s26, 4  ;;  %s1842_s17 = int_to_ptr.vmem [resolvable:$true] %s999_s17 }
  0x84   : > { %848 = vmatprep.subr.bf16.mxu0 %v1331_v22  ;;  %886 = vmatpush1.bf16.msra.mxu1 %v1393_v40  ;;  %v1414_v22 = vld [vmem:[#allocation5 + $0x1c4] ss:$24 sps:$4 sm:$0xff]   ;;  %v1442_v33 = vld [vmem:[#allocation5 + $0x2b0] ss:$24 sps:$4 sm:$0xff]   ;;  %v336_v55 = vsub.s32 3, %v323_v37  ;;  %s1215_s6 = smul.u32 12, %s1599_s16 }
  0x85   : > { %887 = vmatprep.subr.bf16.mxu1 %v1397_v41  ;;  %v344_v41 = vsub.s32 5, %v323_v37  ;;  %s983_s15 = scalar_lea.sflag [#allocation4], %s1805_s23  ;;  %s1509_s16 = scalar_lea.vmem %s1842_s17, 384 }
  0x86   : > { %s995_s5 = sadd.s32 %s1215_s6, %s1214_s21  ;;  %p1510_p6 = scmp.ne.s32.totalorder %s1842_s17, %s1509_s16 }
  0x87   : > { %849 = vmatpush1.bf16.msra.mxu0 %v1333_v26  ;;  %v1426_v26 = vld [vmem:[#allocation5 + $0x224] ss:$24 sps:$4 sm:$0xff]   ;;  %s1207_s28 = sshll.u32 %s995_s5, 6  ;;  %s1513_s10 = sshll.u32 %s1617_s9, 4  ;;  %s1514_s10 = int_to_ptr.vmem [resolvable:$false] %s1513_s10 }
  0x88   : > { %850 = vmatprep.subr.bf16.mxu0 %v1334_v27  ;;  %888 = vmatpush1.bf16.msra.mxu1 %v1399_v44  ;;  %v1424_v27 = vld [vmem:[#allocation5 + $0x220] ss:$24 sps:$4 sm:$0xff]   ;;  %v328_v44 = vsub.s32 1, %v323_v37  ;;  %s1840_s7 = scalar_lea.hbm %s1897_s3, %s1207_s28  ;;  %p1511_p8 = pnand %p1510_p6, %p1743_p11 }
  0x89   : > { %889 = vmatprep.subr.bf16.mxu1 %v1403_v45  ;;  %s1515_s11 = scalar_lea.vmem %s1514_s10, 768  ;;  %p1516_p12 = scmp.lt.s32.totalorder %s1842_s17, %s1514_s10 }
  0x8a   : > { %p1512_p10 = pneg %p1511_p8  ;;  %p1517_p13 = scmp.lt.s32.totalorder %s1515_s11, %s1509_s16 }
  0x8b   : > { %851 = vmatpush1.bf16.msra.mxu0 %v1336_v30  ;;  %v1438_v30 = vld [vmem:[#allocation5 + $0x284] ss:$24 sps:$4 sm:$0xff]  }
  0x8c   : > { %852 = vmatprep.subr.bf16.mxu0 %v1337_v31  ;;  %890 = vmatpush1.bf16.msra.mxu1 %v1405_v48  ;;  %v1436_v31 = vld [vmem:[#allocation5 + $0x280] ss:$24 sps:$4 sm:$0xff]   ;;  %p1518_p3 = por %p1517_p13, %p1516_p12 }
  0x8d   : > { %891 = vmatprep.subr.bf16.mxu1 %v1409_v49 }
  0x8e   : > { %p1519_p7 = pnand %p1518_p3, %p1512_p10 }
  0x8f   : > { %853 = vmatpush1.bf16.msra.mxu0 %v1339_v34  ;;  %v1450_v34 = vld [vmem:[#allocation5 + $0x2e4] ss:$24 sps:$4 sm:$0xff]  }
  0x90   : > { %854 = vmatprep.subr.bf16.mxu0 %v1340_v35  ;;  %892 = vmatpush1.bf16.msra.mxu1 %v1411_v53  ;;  %v1448_v35 = vld [vmem:[#allocation5 + $0x2e0] ss:$24 sps:$4 sm:$0xff]  }
  0x91   : > { %893 = vmatprep.subr.bf16.mxu1 %v1415_v54  ;;  %v332_v54 = vsub.s32 2, %v323_v37 }
  0x93   : > { %855 = vmatpush1.bf16.msra.mxu0 %v1342_v38  ;;  %v340_v38 = vsub.s32 4, %v323_v37 }
  0x94   : > { %856 = vmatprep.subr.bf16.mxu0 %v1343_v39  ;;  %894 = vmatpush1.bf16.msra.mxu1 %v1417_v57  ;;  %v320_v39 = vld [vmem:[%s1896_s2] sm:$0x3f] }
  0x95   : > { %895 = vmatprep.subr.bf16.mxu1 %v1421_v59  ;;  %v341_v40 = vrot.slane %v320_v39, %v340_v38  ;;  %v337_v57 = vrot.slane %v320_v39, %v336_v55 }
  0x97   : > { %857 = vmatpush1.bf16.msra.mxu0 %v1345_v42  ;;  %v345_v42 = vrot.slane %v320_v39, %v344_v41 }
  0x98   : > { %858 = vmatprep.subr.bf16.mxu0 %v1346_v43  ;;  %896 = vmatpush1.bf16.msra.mxu1 %v1423_v62  ;;  %v324_v43 = vsub.s32 0, %v323_v37 }
  0x99   : > { %897 = vmatprep.subr.bf16.mxu1 %v1427_v63 }
  0x9a   : > { %v325_v45 = vrot.slane %v320_v39, %v324_v43 }
  0x9b   : > { %859 = vmatpush1.bf16.msra.mxu0 %v1348_v46  ;;  %v329_v46 = vrot.slane %v320_v39, %v328_v44 }
  0x9c   : > { %860 = vmatprep.subr.bf16.mxu0 %v1349_v47  ;;  %898 = vmatpush1.bf16.msra.mxu1 %v1429_v2 }
  0x9d   : > { %899 = vmatprep.subr.bf16.mxu1 %v1433_v3 }
  0x9f   : > { %861 = vmatpush1.bf16.msra.mxu0 %v1351_v50 }
  0xa0   : > { %862 = vmatprep.subr.bf16.mxu0 %v1352_v51  ;;  %900 = vmatpush1.bf16.msra.mxu1 %v1435_v6 }
  0xa1   : > { %901 = vmatprep.subr.bf16.mxu1 %v1439_v7 }
  0xa3   : > { %863 = vmatpush1.bf16.msra.mxu0 %v1354_v52 }
  0xa4   : > { %914 = vmatprep.subr.bf16.mxu0 %v1360_v56  ;;  %902 = vmatpush1.bf16.msra.mxu1 %v1441_v10  ;;  %v333_v56 = vrot.slane %v320_v39, %v332_v54 }
  0xa5   : > { %903 = vmatprep.subr.bf16.mxu1 %v1445_v11 }
  0xa6   : > { %865 = vmatmul.mubr.bf16.vlgmr.msra.gmra.mrb[0].mxu0 %v1825_v58 }
  0xa7   : > { %915 = vmatpush1.bf16.msra.mxu0 %v1358_v60  ;;  %946 = vmatprep.mubr.bf16.mxu0 %v1820_v17  ;;  %v1394_v17 = vld [vmem:[#allocation5 + $0x130] ss:$24 sps:$4 sm:$0xff]  }
  0xa8   : > { %916 = vmatprep.subr.bf16.mxu0 %v1366_v61  ;;  %904 = vmatpush1.bf16.msra.mxu1 %v1447_v14 }
  0xab   : > { %917 = vmatpush1.bf16.msra.mxu0 %v1364_v0  ;;  %906 = vmatmul.mubr.bf16.vlgmr.msra.gmra.mrb[0].mxu1 %v1825_v58 }
  0xac   : > { %918 = vmatprep.subr.bf16.mxu0 %v1372_v1 }
  0xaf   : > { %919 = vmatpush1.bf16.msra.mxu0 %v1370_v4 }
  0xb0   : > { %920 = vmatprep.subr.bf16.mxu0 %v1378_v5 }
  0xb3   : > { %921 = vmatpush1.bf16.msra.mxu0 %v1376_v8 }
  0xb4   : > { %922 = vmatprep.subr.bf16.mxu0 %v1384_v9 }
  0xb7   : > { %923 = vmatpush1.bf16.msra.mxu0 %v1382_v12 }
  0xb8   : > { %924 = vmatprep.subr.bf16.mxu0 %v1390_v13 }
  0xbb   : > { %925 = vmatpush1.bf16.msra.mxu0 %v1388_v15 }
  0xbc   : > { %926 = vmatprep.subr.bf16.mxu0 %v1396_v16 }
  0xbf   : > { %927 = vmatpush1.bf16.msra.mxu0 %v1394_v17 }
  0xc0   : > { %928 = vmatprep.subr.bf16.mxu0 %v1402_v18 }
  0xc3   : > { %929 = vmatpush1.bf16.msra.mxu0 %v1400_v19 }
  0xc4   : > { %930 = vmatprep.subr.bf16.mxu0 %v1408_v20 }
  0xc7   : > { %931 = vmatpush1.bf16.msra.mxu0 %v1406_v21 }
  0xc8   : > { %932 = vmatprep.subr.bf16.mxu0 %v1414_v22 }
  0xcb   : > { %933 = vmatpush1.bf16.msra.mxu0 %v1412_v23 }
  0xcc   : > { %934 = vmatprep.subr.bf16.mxu0 %v1420_v24 }
  0xcf   : > { %935 = vmatpush1.bf16.msra.mxu0 %v1418_v25 }
  0xd0   : > { %936 = vmatprep.subr.bf16.mxu0 %v1426_v26 }
  0xd3   : > { %937 = vmatpush1.bf16.msra.mxu0 %v1424_v27 }
  0xd4   : > { %938 = vmatprep.subr.bf16.mxu0 %v1432_v28 }
  0xd7   : > { %939 = vmatpush1.bf16.msra.mxu0 %v1430_v29 }
  0xd8   : > { %940 = vmatprep.subr.bf16.mxu0 %v1438_v30 }
  0xdb   : > { %941 = vmatpush1.bf16.msra.mxu0 %v1436_v31 }
  0xdc   : > { %942 = vmatprep.subr.bf16.mxu0 %v1444_v32 }
  0xdf   : > { %943 = vmatpush1.bf16.msra.mxu0 %v1442_v33 }
  0xe0   : > { %944 = vmatprep.subr.bf16.mxu0 %v1450_v34 }
  0xe3   : > { %945 = vmatpush1.bf16.msra.mxu0 %v1448_v35 }
  0xe6   : > { %947 = vmatmul.mubr.bf16.vlgmr.msra.gmra.mrb[4].mxu0 %v1825_v58 }
 0x179   : > { %v866_v47 = vpop.f32.mrb[0].mxu0 }
 0x17a   : > { %v867_v48 = vadd.f32 %v866_v47, %v325_v45  ;;  %v868_v49 = vpop.f32.mrb[1].mxu0 }
 0x17b   : > { %v869_v50 = vadd.f32 %v868_v49, %v329_v46  ;;  %v870_v51 = vpop.f32.mrb[2].mxu0 }
 0x17c   : > { %v871_v52 = vpop.f32.mrb[3].mxu0 }
 0x17d   : > { %v1210_v53 = vpack.c.bf16 %v869_v50, %v867_v48 }
 0x17e   : > { %v907_v58 = vpop.f32.mrb[0].mxu1 }
 0x17f   : > { %979 = vst [vmem:[%s219_s26] sm:$0xff] %v1210_v53  ;;  %v908_v59 = vadd.f32 %v907_v58, %v333_v56  ;;  %v909_v60 = vpop.f32.mrb[1].mxu1 }
 0x180   : > { %v910_v61 = vadd.f32 %v909_v60, %v337_v57  ;;  %v911_v62 = vpop.f32.mrb[2].mxu1 }
 0x181   : > { %v912_v63 = vpop.f32.mrb[3].mxu1 }
 0x182   : > { %v1211_v0 = vpack.c.bf16 %v910_v61, %v908_v59 }
 0x184   : > { %980 = vst [vmem:[%s219_s26 + $0x8] sm:$0xff] %v1211_v0 }
 0x1b9   : > { %v948_v1 = vpop.f32.mrb[4].mxu0 }
 0x1ba   : > { %v949_v2 = vadd.f32 %v948_v1, %v341_v40  ;;  %v950_v3 = vpop.f32.mrb[5].mxu0 }
 0x1bb   : > { %v951_v4 = vadd.f32 %v950_v3, %v345_v42  ;;  %v952_v5 = vpop.f32.mrb[6].mxu0 }
 0x1bc   : > { %v953_v6 = vpop.f32.mrb[7].mxu0 }
 0x1bd   : > { %v1212_v7 = vpack.c.bf16 %v951_v4, %v949_v2 }
 0x1bf   : > { %981 = vst [vmem:[%s219_s26 + $0x10] sm:$0xff] %v1212_v7 }
 0x1c0   : > { %1522 = shalt.err (!%p1519_p7)
}
 0x1c1   : > { %s1523_s23 = scalar_lea.hbm %s1840_s7, 384  ;;  %s1527_s1 = scalar_lea.hbm %s1897_s3, 1536 }
 0x1c2   : > { %p1524_p1 = scmp.ne.s32.totalorder %s1840_s7, %s1523_s23  ;;  %p1528_p9 = scmp.lt.u32.totalorder %s1840_s7, %s1897_s3 }
 0x1c3   : > { %p1529_p5 = scmp.lt.u32.totalorder %s1527_s1, %s1523_s23  ;;  %p1531_p6 = scmp.lt.u32.totalorder %s1523_s23, %s1840_s7 }
 0x1c4   : > { %p1525_p2 = pnand %p1524_p1, %p1743_p11 }
 0x1c5   : > { %p1530_p0 = por %p1529_p5, %p1528_p9 }
 0x1c6   : > { %p1526_p4 = pneg %p1525_p2 }
 0x1c7   : > { %p1532_p8 = por %p1531_p6, %p1530_p0 }
 0x1c9   : > { %p1533_p10 = pnand %p1532_p8, %p1526_p4 }
 0x1cb   : > { %1536 = shalt.err (!%p1533_p10)
}
 0x1cc   : > { %1222 = dma.vmem_to_hbm [thread:$0]  (%p1743_p11), %s1842_s17, 384, %s1840_s7, %s983_s15  }
 0x1cd PF: > { %s1925_s25 = sld [smem:[#allocation12_spill]]  ;;  %p1239_p12 = scmp.ge.s32.totalorder %s1611_s19, 2 }
 0x1ce   : > { %s1011_s26 = sand.u32 1, %s1583_s12  }
 0x1cf   : > { %s1012_s21 = scalar_lea.sflag [#allocation4], %s1011_s26 }
 0x1d3   : > { %p1926_p13 = scmp.ne.s32.totalorder %s1925_s25, 0 }
 0x1d5   : > { %p1233_p3 = pnand %p1239_p12, %p1926_p13 }
 0x1d7   : > { %1578 = dma.done.wait (!%p1233_p3), %s1012_s21, 384  }
 0x1d8   : > { %1580 = vsyncadd (!%p1233_p3), %s1012_s21, 4294966912  ;;  %s20_s19 = sadd.s32 1, %s1611_s19   ;;  %s1927_s15 = sld [smem:[#allocation11_spill]] }
 0x1d9   : > { %p17_p7 = scmp.ge.s32.totalorder %s20_s19, 6   ;;  %s1928_s17 = sld [smem:[#allocation13_spill]] }
 0x1da   : > { %s1929_s29 = sld [smem:[#allocation14_spill]]  ;;  %s1930_s12 = smov %s1587_s13 }
 0x1db   : > { %s1931_s13 = smov %s1591_s14  ;;  %s1932_s14 = smov %s1760_s27 }
 0x1dc   : > { %s1933_s16 = smov %s1607_s18  ;;  %19 = sbr.rel (!%p17_p7) target bundleno = 10 (0xa), region = 81 }
 0x1e0   : > { %s1934_s18 = smov %s1929_s29 }
 0x1e3   :  { %1017 = vsyncpa [#allocation3], 1 }
 0x1e4   :  { %1019 = vsyncpa [#allocation3 + $0x1], 1 }
 0x1e5   :  { %1020 = vsyncpa [#allocation6], 1 }
 0x1e6   :  { %1021 = vsyncpa [#allocation4], 1 }
 0x1e7   :  { %1023 = vsyncpa [#allocation4 + $0x1], 1 }

</bundles_post_ra>
